<compile_context>
chip_gen: v7x
topology: tpu7x:2x2x1
jax: 0.10.0
libtpu: 0.0.40
codegen_flags: <defaults>
</compile_context>

<pallas_src>
import jax
import jax.numpy as jnp
from jax.experimental import pallas as pl
from jax.experimental.pallas import tpu as pltpu


def _make_layernorm_kernel(eps: float, features: int):
    inv_n = 1.0 / float(features)
    # torch.std is unbiased (divides by N-1); guard N==1 against div-by-zero.
    inv_nm1 = 1.0 / float(max(features - 1, 1))

    def layernorm_kernel(x_ref, a_ref, b_ref, o_ref):
        # x_ref: (block_rows, features); a_ref/b_ref: (1, features).
        # The last row block may be partial: rows past the array bound hold
        # unspecified data, but each row's statistics are independent and the
        # corresponding output rows are masked on store, so no masking needed.
        x = x_ref[...].astype(jnp.float32)

        # One-pass statistics: both XLU reductions issue together and overlap
        # with the elementwise (VALU) work below.
        # Note: sumsq - s*mean can cancel when |mean| >> std; acceptable for
        # typical activations (clamped at 0), matches reference within 5e-5.
        s = jnp.sum(x, axis=-1, keepdims=True)
        sq = jnp.sum(x * x, axis=-1, keepdims=True)
        mean = s * inv_n
        var = jnp.maximum(sq - s * mean, 0.0) * inv_nm1      # unbiased variance
        denom = jnp.sqrt(var) + eps                          # eps added to std (torch-style)

        # EUP reciprocal seed + one Newton step on the tiny (block_rows, 1)
        # column -> ~f32 accuracy while keeping the divide off the VALU path.
        inv = pl.reciprocal(denom, approx=True)
        inv = inv * (2.0 - denom * inv)

        y = a_ref[...].astype(jnp.float32) * ((x - mean) * inv) \
            + b_ref[...].astype(jnp.float32)
        o_ref[...] = y.astype(o_ref.dtype)

    return layernorm_kernel


def _vmem_capacity_bytes(default_bytes: int = 64 * 1024 * 1024) -> int:
    """Physical VMEM of the local TPU (v5e/v6e: 128 MiB, v7x: 64 MiB)."""
    try:
        return int(pltpu.get_tpu_info().vmem_capacity_bytes)
    except Exception:
        return default_bytes


def layer_norm_pallas(
    x,
    a_2,
    b_2,
    eps=1e-6,
    block_rows=None,
    target_tile_bytes=None,    # derived from VMEM capacity if None
    vmem_limit_bytes=None,     # derived from VMEM capacity if None
    min_grid_steps=4,          # keep >=4 grid steps (v7x dual-TC + pipelining)
):
    """x: (..., features). a_2, b_2: (features,). Returns same shape/dtype as x."""
    orig_shape = x.shape
    features = int(orig_shape[-1])
    x2d = x.reshape(-1, features)          # metadata-only reshape, no HBM pass
    rows = x2d.shape[0]

    itemsize = jnp.dtype(x.dtype).itemsize
    # Sublane packing: bf16 packs 2 rows / sublane, int8/fp8 pack 4.
    row_pack = {1: 32, 2: 16}.get(itemsize, 8)
    # VMEM rows are lane-padded to a multiple of 128 (on-chip only, HBM exact).
    features_lanes = pl.cdiv(features, 128) * 128

    # --- generation-aware VMEM budget -------------------------------------
    if vmem_limit_bytes is None:
        cap = _vmem_capacity_bytes()
        # Leave headroom below physical VMEM; 128 MiB parts -> ~100 MiB,
        # 64 MiB parts (v7x) -> ~48 MiB.
        vmem_limit_bytes = max(32 << 20, min(cap - (16 << 20), 100 << 20))
    if target_tile_bytes is None:
        # Live VMEM ≈ 2x input + 2x output (double-buffered) + ~3 f32-sized
        # temporaries in the kernel; each f32 temp is (4/itemsize) input tiles.
        live_tiles = 4 + 3 * max(1, 4 // itemsize)
        target_tile_bytes = max(1 << 20, vmem_limit_bytes // (live_tiles + 1))

    # --- tile size ---------------------------------------------------------
    if block_rows is None:
        row_bytes = features_lanes * itemsize
        block_rows = max(row_pack,
                         (target_tile_bytes // row_bytes) // row_pack * row_pack)
    block_rows = max(row_pack, (int(block_rows) // row_pack) * row_pack)
    # Cap so the grid has >= min_grid_steps steps (both v7x TCs get work).
    steps_cap = pl.cdiv(pl.cdiv(rows, max(1, min_grid_steps)), row_pack) * row_pack
    block_rows = min(block_rows, max(row_pack, steps_cap))
    # No larger than the (sublane-rounded) whole array.
    block_rows = min(block_rows, pl.cdiv(rows, row_pack) * row_pack)

    grid = pl.cdiv(rows, block_rows)       # partial last block handled by Pallas

    a2d = a_2.reshape(1, features)
    b2d = b_2.reshape(1, features)

    kernel = _make_layernorm_kernel(float(eps), features)

    # Note: a2d/b2d are tiny (1, features) blocks re-fetched each step; left on
    # the default pipeline (negligible vs. the main tile DMA).
    out = pl.pallas_call(
        kernel,
        out_shape=jax.ShapeDtypeStruct((rows, features), x.dtype),
        grid_spec=pltpu.PrefetchScalarGridSpec(
            num_scalar_prefetch=0,
            grid=(grid,),
            in_specs=[
                pl.BlockSpec((block_rows, features), lambda i: (i, 0)),
                pl.BlockSpec((1, features), lambda i: (0, 0)),
                pl.BlockSpec((1, features), lambda i: (0, 0)),
            ],
            out_specs=pl.BlockSpec((block_rows, features), lambda i: (i, 0)),
        ),
        compiler_params=pltpu.CompilerParams(
            dimension_semantics=("parallel",),
            vmem_limit_bytes=int(vmem_limit_bytes),
        ),
    )(x2d, a2d, b2d)

    return out.reshape(orig_shape)


if __name__ == "__main__":
    key = jax.random.PRNGKey(0)
    batch, seq, hidden = 2, 8, 32

    x = jax.random.normal(key, (batch, seq, hidden), dtype=jnp.float32)
    # nn.Parameter(torch.ones(features)) / torch.zeros(features)
    a_2 = jnp.ones((hidden,), dtype=jnp.float32)
    b_2 = jnp.zeros((hidden,), dtype=jnp.float32)

    out = jax.block_until_ready(layer_norm_pallas(x, a_2, b_2, eps=1e-6))

    # Pure-JAX reference (torch semantics: unbiased std, eps added to std).
    def ref_layernorm(xf, a, b, eps):
        mean = jnp.mean(xf, axis=-1, keepdims=True)
        diff = xf - mean
        std = jnp.sqrt(jnp.sum(diff * diff, axis=-1, keepdims=True)
                       / (xf.shape[-1] - 1))
        return a * diff / (std + eps) + b

    ref = ref_layernorm(x, a_2, b_2, 1e-6)
    assert out.shape == x.shape and out.dtype == x.dtype
    assert jnp.max(jnp.abs(out - ref)) < 5e-5

    # bf16 sanity check (exercises the 16-row sublane-pack path).
    xb = x.astype(jnp.bfloat16)
    outb = jax.block_until_ready(layer_norm_pallas(xb, a_2, b_2, eps=1e-6))
    refb = ref_layernorm(xb.astype(jnp.float32), a_2, b_2, 1e-6)
    assert outb.shape == xb.shape and outb.dtype == jnp.bfloat16
    assert jnp.max(jnp.abs(outb.astype(jnp.float32) - refb)) < 5e-2

    # Row count not divisible by block_rows: exercises the un-padded partial
    # last block (no wrapper padding / slicing anywhere).
    xo = jax.random.normal(jax.random.PRNGKey(1), (3, 7, hidden), dtype=jnp.float32)
    outo = jax.block_until_ready(layer_norm_pallas(xo, a_2, b_2, eps=1e-6))
    refo = ref_layernorm(xo, a_2, b_2, 1e-6)
    assert outo.shape == xo.shape
    assert jnp.max(jnp.abs(outo - refo)) < 5e-5

    print("KERNEL_OK")
</pallas_src>

<mosaic_0001>
module attributes {stable_mosaic.version = 11 : i64} {
  func.func @layernorm_kernel(%arg0: i32, %arg1: memref<8x32xf32, #tpu.memory_space<vmem>>, %arg2: memref<1x32xf32, #tpu.memory_space<vmem>>, %arg3: memref<1x32xf32, #tpu.memory_space<vmem>>, %arg4: memref<8x32xf32, #tpu.memory_space<vmem>>) attributes {dimension_semantics = [#tpu.dimension_semantics<parallel>], iteration_bounds = array<i64: 2>, scalar_prefetch = 0 : i64, scratch_operands = 0 : i64, tpu.core_type = #tpu.core_type<tc>, window_params = [{transform_indices = @transform_0, window_bounds = array<i64: 8, 32>}, {pipeline_mode = #tpu.pipeline_mode<synchronous>, transform_indices = @transform_1, window_bounds = array<i64: 1, 32>}, {pipeline_mode = #tpu.pipeline_mode<synchronous>, transform_indices = @transform_2, window_bounds = array<i64: 1, 32>}, {transform_indices = @transform_3, window_bounds = array<i64: 8, 32>}]} {
    %c0 = arith.constant 0 : index
    %c0_0 = arith.constant 0 : index
    %0 = vector.load %arg1[%c0, %c0_0] : memref<8x32xf32, #tpu.memory_space<vmem>>, vector<8x32xf32>
    %cst = arith.constant dense<0.000000e+00> : vector<8xf32>
    %1 = vector.multi_reduction <add>, %0, %cst [1] : vector<8x32xf32> to vector<8xf32>
    %2 = vector.shape_cast %1 : vector<8xf32> to vector<8x1xf32>
    %3 = arith.mulf %0, %0 : vector<8x32xf32>
    %cst_1 = arith.constant dense<0.000000e+00> : vector<8xf32>
    %4 = vector.multi_reduction <add>, %3, %cst_1 [1] : vector<8x32xf32> to vector<8xf32>
    %5 = vector.shape_cast %4 : vector<8xf32> to vector<8x1xf32>
    %cst_2 = arith.constant 3.125000e-02 : f32
    %6 = vector.broadcast %cst_2 : f32 to vector<8x1xf32>
    %7 = arith.mulf %2, %6 : vector<8x1xf32>
    %8 = arith.mulf %2, %7 : vector<8x1xf32>
    %9 = arith.subf %5, %8 : vector<8x1xf32>
    %cst_3 = arith.constant 0.000000e+00 : f32
    %10 = vector.broadcast %cst_3 : f32 to vector<8x1xf32>
    %11 = arith.maximumf %9, %10 : vector<8x1xf32>
    %cst_4 = arith.constant 0.0322580636 : f32
    %12 = vector.broadcast %cst_4 : f32 to vector<8x1xf32>
    %13 = arith.mulf %11, %12 : vector<8x1xf32>
    %14 = math.sqrt %13 : vector<8x1xf32>
    %cst_5 = arith.constant 9.99999997E-7 : f32
    %15 = vector.broadcast %cst_5 : f32 to vector<8x1xf32>
    %16 = arith.addf %14, %15 : vector<8x1xf32>
    %17 = tpu.reciprocal %16 {approx = true} : vector<8x1xf32> -> vector<8x1xf32>
    %18 = arith.mulf %16, %17 : vector<8x1xf32>
    %cst_6 = arith.constant 2.000000e+00 : f32
    %19 = vector.broadcast %cst_6 : f32 to vector<8x1xf32>
    %20 = arith.subf %19, %18 : vector<8x1xf32>
    %21 = arith.mulf %17, %20 : vector<8x1xf32>
    %c0_7 = arith.constant 0 : index
    %c0_8 = arith.constant 0 : index
    %22 = vector.load %arg2[%c0_7, %c0_8] : memref<1x32xf32, #tpu.memory_space<vmem>>, vector<1x32xf32>
    %23 = vector.broadcast %7 : vector<8x1xf32> to vector<8x32xf32>
    %24 = arith.subf %0, %23 : vector<8x32xf32>
    %25 = vector.broadcast %21 : vector<8x1xf32> to vector<8x32xf32>
    %26 = arith.mulf %24, %25 : vector<8x32xf32>
    %27 = vector.broadcast %22 : vector<1x32xf32> to vector<8x32xf32>
    %28 = arith.mulf %27, %26 : vector<8x32xf32>
    %c0_9 = arith.constant 0 : index
    %c0_10 = arith.constant 0 : index
    %29 = vector.load %arg3[%c0_9, %c0_10] : memref<1x32xf32, #tpu.memory_space<vmem>>, vector<1x32xf32>
    %30 = vector.broadcast %29 : vector<1x32xf32> to vector<8x32xf32>
    %31 = arith.addf %28, %30 : vector<8x32xf32>
    %c0_11 = arith.constant 0 : index
    %c0_12 = arith.constant 0 : index
    %32 = vector.load %arg4[%c0_11, %c0_12] : memref<8x32xf32, #tpu.memory_space<vmem>>, vector<8x32xf32>
    tpu.vector_store %arg4[%c0_11, %c0_12], %31 {strides = array<i32>} : memref<8x32xf32, #tpu.memory_space<vmem>>, vector<8x32xf32>,
    return
  }
  func.func @transform_0(%arg0: i32) -> (i32, i32) {
    %c0_i32 = arith.constant 0 : i32
    %c0_i32_0 = arith.constant 0 : i32
    return %arg0, %c0_i32 : i32, i32
  }
  func.func @transform_1(%arg0: i32) -> (i32, i32) {
    %c0_i32 = arith.constant 0 : i32
    %c0_i32_0 = arith.constant 0 : i32
    %c0_i32_1 = arith.constant 0 : i32
    return %c0_i32, %c0_i32_0 : i32, i32
  }
  func.func @transform_2(%arg0: i32) -> (i32, i32) {
    %c0_i32 = arith.constant 0 : i32
    %c0_i32_0 = arith.constant 0 : i32
    %c0_i32_1 = arith.constant 0 : i32
    return %c0_i32, %c0_i32_0 : i32, i32
  }
  func.func @transform_3(%arg0: i32) -> (i32, i32) {
    %c0_i32 = arith.constant 0 : i32
    %c0_i32_0 = arith.constant 0 : i32
    return %arg0, %c0_i32 : i32, i32
  }
}

</mosaic_0001>

<bundles_post_ra>
// kernel: tpu_custom_call.1
= control target key start
LH: loop header
LB: loop body
LE: loop exit
PB: predicated region body
PF: predicated region fallthrough
CT: control target
= control target key end

     0   :  { %8 = vsyncpa [#allocation3], 0  ;;  %s673_s0 = inlined_call_operand.hbm [shape: f32[16,32], index: 0, kind: input, shape index: {}]   ;;  %s674_s1 = inlined_call_operand.vmem [shape: f32[1,32], index: 1, kind: input, shape index: {}]   ;;  %s675_s2 = inlined_call_operand.vmem [shape: f32[1,32], index: 2, kind: input, shape index: {}]   ;;  %s676_s3 = inlined_call_operand.hbm [shape: f32[16,32], index: 3, kind: output, shape index: {}]  }
   0x1   :  { %10 = vsyncpa [#allocation3 + $0x1], 0 }
   0x2   :  { %11 = vsyncpa [#allocation4], 0 }
   0x3   :  { %13 = vsyncpa [#allocation4 + $0x1], 0  ;;  %s499_s12 = smov 0   ;;  %s501_s13 = smov 0  }
   0x4   :  { %s503_s14 = smov 0   ;;  %s505_s15 = smov 0  }
   0x5 LB: > { %s520_s16 = sadd.s32 4294967295, %s475_s15   ;;  %s315_s17 = sadd.s32 4294967294, %s475_s15   ;;  %s475_s15 = sphi %s505_s15, %s691_s15   ;;  %s471_s14 = sphi %s503_s14, %s690_s14   ;;  %s467_s13 = sphi %s501_s13, %s689_s13   ;;  %s463_s12 = sphi %s499_s12, %s688_s12  }
   0x6   : > { %s524_s18 = sadd.s32 1, %s475_s15   ;;  %s26_s19 = sadd.s32 1, %s471_s14 }
   0x7   : > { %s23_s20 = ssub.s32 %s475_s15, %s524_s18  ;;  %p33_p0 = scmp.ne.s32.totalorder %s471_s14, %s467_s13 }
   0x8   : > { %p24_p1 = scmp.eq.s32.totalorder %s23_s20, 0  ;;  %p34_p2 = scmp.eq.s32.totalorder %s475_s15, 0 }
   0x9   : > { %p39_p3 = scmp.ne.s32.totalorder %s467_s13, %s463_s12  ;;  %p40_p4 = scmp.eq.s32.totalorder %s520_s16, 0 }
   0xa   : > { %s536_s21 = scalar_select %p24_p1, %s471_s14, %s26_s19  }
   0xb   : > { %p538_p5 = por %p34_p2, %p33_p0  ;;  %p542_p6 = por %p40_p4, %p39_p3 }
   0xc   : > { %p105_p7 = scmp.eq.s32.totalorder %s520_s16, 1  ;;  %p111_p8 = scmp.eq.s32.totalorder %s315_s17, 1 }
   0xd   : > { %p341_p10 = scmp.lt.s32.totalorder %s475_s15, 2  ;;  %s137_s26 = sand.u32 1, %s471_s14  }
   0xe   : > { %p549_p11 = por %p105_p7, %p33_p0  ;;  %p553_p12 = por %p111_p8, %p39_p3 }
   0xf   : > { %s319_s27 = sshll.u32 %s475_s15, 7  ;;  %s318_s28 = sshll.u32 %s137_s26, 3 }
  0x10   : > { %s680_s24 = scalar_select %p549_p11, 1, 0 }
  0x11   : > { %s681_s25 = scalar_select %p553_p12, 1, 0 }
  0x12   : > { %s562_s4 = scalar_lea.hbm %s673_s0, %s319_s27  ;;  %s141_s5 = scalar_lea.vmem [#allocation2], %s318_s28 }
  0x13   : > { %s148_s6 = sshll.u32 %s141_s5, 4  ;;  %p566_p13 = pnand %p341_p10, %p538_p5  ;;  %s570_s6 = int_to_ptr.vmem [resolvable:$true] %s148_s6 }
  0x14   : > { %s138_s8 = scalar_lea.sflag [#allocation3], %s137_s26  ;;  %s379_s9 = scalar_lea.hbm %s562_s4, 128 }
  0x15   : > { %p380_p2 = scmp.ne.s32.totalorder %s562_s4, %s379_s9  ;;  %p381_p3 = pneg %p566_p13 }
  0x16   : > { %s384_s17 = scalar_lea.hbm %s673_s0, 256  ;;  %p385_p5 = scmp.lt.u32.totalorder %s562_s4, %s673_s0 }
  0x17   : > { %p382_p4 = pnand %p381_p3, %p380_p2  ;;  %p386_p8 = scmp.lt.u32.totalorder %s384_s17, %s379_s9 }
  0x18   : > { %p388_p9 = scmp.lt.u32.totalorder %s379_s9, %s562_s4 }
  0x19   : > { %p383_p7 = pneg %p382_p4  ;;  %p387_p10 = por %p386_p8, %p385_p5 }
  0x1b   : > { %p389_p0 = por %p388_p9, %p387_p10 }
  0x1d   : > { %p390_p1 = pnand %p389_p0, %p383_p7 }
  0x1f   : > { %393 = shalt.err (!%p390_p1)
}
  0x20   : > { %s394_s22 = scalar_lea.vmem %s570_s6, 128  ;;  %s477_s26 = smov [#allocation2]  }
  0x21   : > { %p395_p2 = scmp.ne.s32.totalorder %s570_s6, %s394_s22  ;;  %s399_s27 = sshll.u32 %s477_s26, 4  ;;  %s400_s27 = int_to_ptr.vmem [resolvable:$false] %s399_s27 }
  0x22   : > { %s401_s28 = scalar_lea.vmem %s400_s27, 256  ;;  %p402_p11 = scmp.lt.s32.totalorder %s570_s6, %s400_s27 }
  0x23   : > { %p397_p4 = pnand %p395_p2, %p381_p3  ;;  %p403_p5 = scmp.lt.s32.totalorder %s401_s28, %s394_s22 }
  0x25   : > { %p398_p12 = pneg %p397_p4  ;;  %p404_p8 = por %p403_p5, %p402_p11 }
  0x27   : > { %p405_p9 = pnand %p404_p8, %p398_p12 }
  0x29   : > { %408 = shalt.err (!%p405_p9)
}
  0x2a   : > { %336 = dma.hbm_to_vmem [thread:$0]  (!%p566_p13), %s562_s4, 128, %s570_s6, %s138_s8  }
  0x2b   : > { %p683_p0 = scmp.lt.s32.totalorder %s475_s15, 3  ;;  %p684_p1 = scmp.ge.s32.totalorder %s475_s15, 1 }
  0x2d   : > { %p154_p3 = pnand %p684_p1, %p683_p0 }
  0x2e   : > { %s604_s29 = sand.u32 (!%p154_p3), 1, %s467_s13  }
  0x2f   : > { %157 = sbr.rel (%p154_p3) target bundleno = 263 (0x107), region = 32  ;;  %s321_s30 = sshll.u32 (!%p154_p3), %s604_s29, 3 }
  0x30   : > { %s160_s5 = scalar_lea.sflag (!%p154_p3), [#allocation3], %s604_s29  ;;  %s163_s7 = scalar_lea.vmem (!%p154_p3), [#allocation2], %s321_s30 }
  0x36   : > { %454 = dma.done.wait (%p542_p6), %s160_s5, 128  }
  0x37   : > { %456 = vsyncadd (%p542_p6), %s160_s5, 4294967168  ;;  %vm187_vm0 = vcmask 261120   ;;  %v186_v0 = vld [vmem:[%s163_s7] sm:$0xff]  ;;  %s326_s9 = sshll.u32 %s520_s16, 7  ;;  %s185_s10 = scalar_lea.vmem [#allocation5], %s321_s30 }
  0x38   : > { %v188_v1 = vsel %vm187_vm0, %v186_v0, 0.0  ;;  %v191_v2 = vmul.f32 %v186_v0, %v186_v0  ;;  %v323_v22 = vld [vmem:[%s674_s1] ss:$0 sm:$0xff]  ;;  %s245_s11 = sshll.u32 %s185_s10, 4  ;;  %s628_s20 = scalar_lea.hbm %s676_s3, %s326_s9  ;;  %s630_s11 = int_to_ptr.vmem [resolvable:$true] %s245_s11 }
  0x39   : > { %189 = vadd.xlane.f32.xlu0 %v188_v1  ;;  %v324_v24 = vld [vmem:[%s675_s2] ss:$0 sm:$0xff]  ;;  %s232_s22 = scalar_lea.sflag [#allocation4], %s604_s29  ;;  %s409_s26 = scalar_lea.vmem %s630_s11, 128 }
  0x3a   : > { %v192_v3 = vsel %vm187_vm0, %v191_v2, 0.0  ;;  %p410_p6 = scmp.ne.s32.totalorder %s630_s11, %s409_s26  ;;  %p685_p11 = scmp.ne.s32.totalorder %s680_s24, 0 }
  0x3b   : > { %s478_s16 = smov [#allocation5]  }
  0x3c   : > { %p411_p12 = pnand %p410_p6, %p685_p11  ;;  %s413_s27 = sshll.u32 %s478_s16, 4  ;;  %s414_s27 = int_to_ptr.vmem [resolvable:$false] %s413_s27 }
  0x3d   : > { %193 = vadd.xlane.f32.xlu0 %v192_v3  ;;  %s415_s28 = scalar_lea.vmem %s414_s27, 256  ;;  %p416_p7 = scmp.lt.s32.totalorder %s630_s11, %s414_s27 }
  0x3e   : > { %p412_p13 = pneg %p411_p12  ;;  %p417_p10 = scmp.lt.s32.totalorder %s415_s28, %s409_s26 }
  0x40   : > { %p418_p2 = por %p417_p10, %p416_p7 }
  0x42   : > { %p419_p4 = pnand %p418_p2, %p412_p13 }
  0xc6   : > { %v190_v4 = vpop.xlane.xlu0 %189 }
  0xc7   : > { %v195_v5 = vmul.f32 0.03125, %v190_v4 }
  0xc9   : > { %v196_v6 = vmul.f32 %v195_v5, %v190_v4  ;;  %v213_v20 = vsub.f32 %v186_v0, %v195_v5 }
  0xca   : > { %v194_v7 = vpop.xlane.xlu0 %193 }
  0xcb   : > { %v197_v8 = vsub.f32 %v194_v7, %v196_v6 }
  0xcd   : > { %v198_v9 = vmax.f32 %v197_v8, 0.0 }
  0xcf   : > { %v199_v10 = vmul.f32 0.032258064, %v198_v9 }
  0xd1   : > { %375 = vrsqrt.f32 %v199_v10  ;;  %vm202_vm1 = vcmp.eq.f32.partialorder %v199_v10, inf  ;;  %v205_v13 = vand.u32 2147483648, %v199_v10  ;;  %vm204_vm2 = vcmp.eq.f32.partialorder %v199_v10, 0.0 }
  0xdb   : > { %v376_v11 = vpop.eup %375 }
  0xdc   : > { %v201_v12 = vmul.f32 %v376_v11, %v199_v10 }
  0xde   : > { %v203_v14 = vsel %vm202_vm1, %v199_v10, %v201_v12 }
  0xdf   : > { %v206_v15 = vsel %vm204_vm2, %v205_v13, %v203_v14 }
  0xe0   : > { %v207_v16 = vadd.f32 1e-06, %v206_v15 }
  0xe2   : > { %377 = vrcp.f32 %v207_v16 }
  0xec   : > { %v378_v17 = vpop.eup %377 }
  0xed   : > { %v209_v18 = vmul.f32 %v378_v17, %v207_v16 }
  0xef   : > { %v210_v19 = vsub.f32 2.0, %v209_v18 }
  0xf1   : > { %v211_v21 = vmul.f32 %v378_v17, %v210_v19 }
  0xf3   : > { %v214_v23 = vmul.f32 %v213_v20, %v211_v21 }
  0xf5   : > { %v221_v25 = vmul.f32 %v323_v22, %v214_v23 }
  0xf7   : > { %v229_v26 = vadd.f32 %v324_v24, %v221_v25 }
  0xf9   : > { %230 = vst.msk [vmem:[%s185_s10] sm:$0xff] %vm187_vm0, %v229_v26 }
  0xfa   : > { %422 = shalt.err (!%p419_p4)
}
  0xfb   : > { %s423_s29 = scalar_lea.hbm %s628_s20, 128  ;;  %s427_s7 = scalar_lea.hbm %s676_s3, 256 }
  0xfc   : > { %p424_p5 = scmp.ne.s32.totalorder %s628_s20, %s423_s29  ;;  %p428_p0 = scmp.lt.u32.totalorder %s628_s20, %s676_s3 }
  0xfd   : > { %p429_p1 = scmp.lt.u32.totalorder %s427_s7, %s423_s29  ;;  %p431_p6 = scmp.lt.u32.totalorder %s423_s29, %s628_s20 }
  0xfe   : > { %p425_p8 = pnand %p424_p5, %p685_p11 }
  0xff   : > { %p430_p3 = por %p429_p1, %p428_p0 }
 0x100   : > { %p426_p9 = pneg %p425_p8 }
 0x101   : > { %p432_p12 = por %p431_p6, %p430_p3 }
 0x103   : > { %p433_p13 = pnand %p432_p12, %p426_p9 }
 0x105   : > { %436 = shalt.err (!%p433_p13)
}
 0x106   : > { %331 = dma.vmem_to_hbm [thread:$0]  (%p685_p11), %s630_s11, 128, %s628_s20, %s232_s22  }
 0x107 PF: > { %s257_s6 = sand.u32 1, %s463_s12   ;;  %p686_p7 = scmp.ne.s32.totalorder %s681_s25, 0 }
 0x108   : > { %p687_p10 = scmp.ge.s32.totalorder %s475_s15, 2  ;;  %s258_s8 = scalar_lea.sflag [#allocation4], %s257_s6 }
 0x10a   : > { %p338_p2 = pnand %p687_p10, %p686_p7 }
 0x10c   : > { %458 = dma.done.wait (!%p338_p2), %s258_s8, 128  }
 0x10d   : > { %460 = vsyncadd (!%p338_p2), %s258_s8, 4294967168  ;;  %p16_p4 = scmp.ge.s32.totalorder %s524_s18, 4   ;;  %s688_s12 = smov %s467_s13 }
 0x10e   : > { %s689_s13 = smov %s471_s14  ;;  %s690_s14 = smov %s536_s21 }
 0x10f   : > { %s691_s15 = smov %s524_s18  ;;  %18 = sbr.rel (!%p16_p4) target bundleno = 5 (0x5), region = 77 }
 0x116   :  { %263 = vsyncpa [#allocation3], 1 }
 0x117   :  { %265 = vsyncpa [#allocation3 + $0x1], 1 }
 0x118   :  { %266 = vsyncpa [#allocation4], 1 }
 0x119   :  { %268 = vsyncpa [#allocation4 + $0x1], 1 }

</bundles_post_ra>
